<compile_context>
chip_gen: v7x
topology: tpu7x:2x2x1
jax: 0.10.0
libtpu: 0.0.40
codegen_flags: <defaults>
</compile_context>

<pallas_src>
import jax
import jax.numpy as jnp
from jax.experimental import pallas as pl
from jax.experimental.pallas import tpu as pltpu

LANE = 128          # lane width / padded N per block
KB = 128            # padded K (rows) per weight block
NUM_BLOCKS = 4      # fused-fuse_emb + 3 policy_head linears
BIAS_ROWS = 16      # bias block rows (full bf16 sublane tile; rows 0..3 used)


def make_kernel(E, P):
    """Fused MLP kernel; all slices are full-lane and 16-row aligned (static offsets)."""
    W0, W1, W2, W3 = 0 * KB, 1 * KB, 2 * KB, 3 * KB
    BOFF = NUM_BLOCKS * KB

    def kernel(emb_ref, ft_ref, w_ref, out_ref):
        emb = emb_ref[...].astype(jnp.bfloat16)                      # [B, E]
        ft = ft_ref[...].astype(jnp.bfloat16)                        # [B, P]
        b = w_ref[BOFF:BOFF + BIAS_ROWS, :].astype(jnp.float32)      # [16, 128] bias rows

        # Front-end: concat([emb, extra]) @ Wf folded + split into two dots (in-kernel concat-free).
        z = (jnp.dot(emb, w_ref[W0:W0 + E, :], preferred_element_type=jnp.float32)
             + jnp.dot(ft, w_ref[W0 + E:W0 + E + P, :], preferred_element_type=jnp.float32)
             + b[0:1, :])
        # policy_head (DeterministicHead, num_layers=2): Linear->ReLU->Linear->ReLU->Linear.
        h = jnp.maximum(
            jnp.dot(z.astype(jnp.bfloat16), w_ref[W1:W1 + KB, :],
                    preferred_element_type=jnp.float32) + b[1:2, :], 0.0)
        h = jnp.maximum(
            jnp.dot(h.astype(jnp.bfloat16), w_ref[W2:W2 + KB, :],
                    preferred_element_type=jnp.float32) + b[2:3, :], 0.0)
        out = (jnp.dot(h.astype(jnp.bfloat16), w_ref[W3:W3 + KB, :],
                       preferred_element_type=jnp.float32) + b[3:4, :])
        out_ref[...] = out.astype(out_ref.dtype)                     # lane-dense [B, 128] store

    return kernel


def pack_params(params):
    """One-time prep: fold extra_states_encoder into fuse_emb, pad every block to 128x128,
    append bias rows, cast the single slab to bf16.  Returns [NUM_BLOCKS*128 + 16, 128] bf16."""
    # Exact algebraic fold (no nonlinearity between the two Linears):
    #   z = emb @ wf_e + (ft @ w_es + b_es) @ wf_x + bf
    #     = emb @ wf_e + ft @ (w_es @ wf_x) + (b_es @ wf_x + bf)
    w_ftz = jnp.dot(params["w_es"], params["wf_x"])                   # [P, D]
    b0 = jnp.dot(params["b_es"], params["wf_x"]) + params["bf"]       # [1, D]
    w0 = jnp.concatenate([params["wf_e"], w_ftz], axis=0)             # [D, D]

    blocks = [(w0, b0),
              (params["w1"], params["b1"]),
              (params["w2"], params["b2"]),
              (params["w3"], params["b3"])]

    slab = jnp.zeros((NUM_BLOCKS * KB + BIAS_ROWS, LANE), jnp.float32)
    for i, (w, b) in enumerate(blocks):
        k, n = w.shape
        assert k <= KB and n <= LANE
        slab = slab.at[i * KB:i * KB + k, :n].set(w)
        slab = slab.at[NUM_BLOCKS * KB + i, :n].set(b[0])
    return slab.astype(jnp.bfloat16)


def basemodel_forward(embedding, ft_state, w_slab, action_dim):
    """Full spatial-encode forward pass in one fused Pallas kernel (no wrapper concat)."""
    B, E = embedding.shape
    P = ft_state.shape[1]
    kernel = make_kernel(E, P)

    flops = 2 * B * (E * LANE + P * LANE + 3 * KB * LANE)
    bytes_accessed = 4 * (embedding.size + ft_state.size + B * LANE) + 2 * w_slab.size

    vmem = pl.BlockSpec(memory_space=pltpu.MemorySpace.VMEM)
    out_pad = pl.pallas_call(
        kernel,
        out_shape=jax.ShapeDtypeStruct((B, LANE), jnp.float32),       # lane-dense output
        in_specs=[vmem, vmem, vmem],
        out_specs=vmem,
        cost_estimate=pl.CostEstimate(flops=flops, transcendentals=0,
                                      bytes_accessed=bytes_accessed),
    )(embedding, ft_state, w_slab)
    # Action slice stays under jit so it fuses with the consumer (or consume out_pad directly).
    return out_pad[:, :action_dim]


def _linear_init(key, fan_in, fan_out):
    """Deterministic nn.Linear-style init: U(-1/sqrt(fan_in), 1/sqrt(fan_in))."""
    kw, kb = jax.random.split(key)
    bound = 1.0 / (fan_in ** 0.5)
    w = jax.random.uniform(kw, (fan_in, fan_out), jnp.float32, -bound, bound)
    b = jax.random.uniform(kb, (1, fan_out), jnp.float32, -bound, bound)
    return w, b


def make_params(key, E, P, H, A):
    D = E + P  # policy_head_input_size = embedding_dim + extra_states_encoder.input_size
    keys = jax.random.split(key, 5)
    w_es, b_es = _linear_init(keys[0], P, P)   # extra_states_encoder
    wf, bf = _linear_init(keys[1], D, D)       # fuse_emb (DynamicMLP, one Linear)
    w1, b1 = _linear_init(keys[2], D, H)       # policy_head layer 1
    w2, b2 = _linear_init(keys[3], H, H)       # policy_head layer 2
    w3, b3 = _linear_init(keys[4], H, A)       # policy_head output
    return dict(w_es=w_es, b_es=b_es,
                wf_e=wf[:E, :], wf_x=wf[E:, :], bf=bf,
                w1=w1, b1=b1, w2=w2, b2=b2, w3=w3, b3=b3)


def reference_forward(embedding, ft_state, params):
    """Pure-JAX f32 reference of the original (unfused) module forward, for semantics."""
    extra = ft_state @ params["w_es"] + params["b_es"]
    x = jnp.concatenate([embedding, extra], axis=-1)
    wf = jnp.concatenate([params["wf_e"], params["wf_x"]], axis=0)
    z = x @ wf + params["bf"]
    h = jnp.maximum(z @ params["w1"] + params["b1"], 0.0)
    h = jnp.maximum(h @ params["w2"] + params["b2"], 0.0)
    return h @ params["w3"] + params["b3"]


def slab_reference(embedding, ft_state, w_slab, E, P):
    """Precision-matched reference: same bf16 slab, bf16 operands, f32 accumulation."""
    f32, bf16 = jnp.float32, jnp.bfloat16
    b = w_slab[NUM_BLOCKS * KB:NUM_BLOCKS * KB + 4, :].astype(f32)
    emb = embedding.astype(bf16)
    ft = ft_state.astype(bf16)
    z = (jnp.dot(emb, w_slab[0:E, :], preferred_element_type=f32)
         + jnp.dot(ft, w_slab[E:E + P, :], preferred_element_type=f32) + b[0:1, :])
    h = jnp.maximum(jnp.dot(z.astype(bf16), w_slab[KB:2 * KB, :],
                            preferred_element_type=f32) + b[1:2, :], 0.0)
    h = jnp.maximum(jnp.dot(h.astype(bf16), w_slab[2 * KB:3 * KB, :],
                            preferred_element_type=f32) + b[2:3, :], 0.0)
    return jnp.dot(h.astype(bf16), w_slab[3 * KB:4 * KB, :],
                   preferred_element_type=f32) + b[3:4, :]


if __name__ == "__main__":
    B, E, P, H, A = 2, 64, 32, 64, 9   # batch, embedding_dim (ViT), proprio dim, hidden, action dim

    root = jax.random.PRNGKey(0)
    k_emb, k_ft, k_par = jax.random.split(root, 3)
    embedding = jax.random.normal(k_emb, (B, E), jnp.float32)
    ft_state = jax.random.normal(k_ft, (B, P), jnp.float32)
    params = make_params(k_par, E, P, H, A)

    w_slab = pack_params(params)                       # one-time fold + single bf16 slab

    fwd = jax.jit(lambda e, f: basemodel_forward(e, f, w_slab, A))
    dist = jax.block_until_ready(fwd(embedding, ft_state))

    assert dist.shape == (B, A)

    # 1) Tight check vs a precision-matched (bf16 slab / f32 accumulate) reference: kernel math.
    ref_matched = slab_reference(embedding, ft_state, w_slab, E, P)[:, :A]
    assert jnp.allclose(dist, ref_matched, atol=1e-3, rtol=1e-3), \
        "Pallas kernel mismatch vs precision-matched reference"

    # 2) Loose check vs the original f32 module semantics (bf16 weight/activation rounding).
    ref_f32 = reference_forward(embedding, ft_state, params)
    assert jnp.allclose(dist, ref_f32, atol=1e-1, rtol=1e-1), \
        "Pallas kernel mismatch vs f32 module reference"

    print("KERNEL_OK")
</pallas_src>

<mosaic_0001>
module attributes {stable_mosaic.version = 11 : i64} {
  func.func @kernel(%arg0: memref<2x64xf32, #tpu.memory_space<vmem>>, %arg1: memref<2x32xf32, #tpu.memory_space<vmem>>, %arg2: memref<528x128xbf16, #tpu.memory_space<vmem>>, %arg3: memref<2x128xf32, #tpu.memory_space<vmem>>) attributes {dimension_semantics = [], scalar_prefetch = 0 : i64, scratch_operands = 0 : i64, tpu.core_type = #tpu.core_type<tc>} {
    %c0 = arith.constant 0 : index
    %c0_0 = arith.constant 0 : index
    %0 = vector.load %arg0[%c0, %c0_0] : memref<2x64xf32, #tpu.memory_space<vmem>>, vector<2x64xf32>
    %1 = arith.truncf %0 : vector<2x64xf32> to vector<2x64xbf16>
    %c0_1 = arith.constant 0 : index
    %c0_2 = arith.constant 0 : index
    %2 = vector.load %arg1[%c0_1, %c0_2] : memref<2x32xf32, #tpu.memory_space<vmem>>, vector<2x32xf32>
    %3 = arith.truncf %2 : vector<2x32xf32> to vector<2x32xbf16>
    %c512 = arith.constant 512 : index
    %c0_3 = arith.constant 0 : index
    %4 = vector.load %arg2[%c512, %c0_3] : memref<528x128xbf16, #tpu.memory_space<vmem>>, vector<16x128xbf16>
    %5 = arith.extf %4 : vector<16x128xbf16> to vector<16x128xf32>
    %c0_4 = arith.constant 0 : index
    %c0_5 = arith.constant 0 : index
    %6 = vector.load %arg2[%c0_4, %c0_5] : memref<528x128xbf16, #tpu.memory_space<vmem>>, vector<64x128xbf16>
    %cst = arith.constant dense<0.000000e+00> : vector<2x128xf32>
    %7 = tpu.matmul %1, %6, %cst {dimension_numbers = #tpu.dot_dimension_numbers<[1], [0], [0], [1], [0, 0, 1, 1], [], []>} : vector<2x64xbf16>, vector<64x128xbf16>, vector<2x128xf32> -> vector<2x128xf32>
    %c64 = arith.constant 64 : index
    %c0_6 = arith.constant 0 : index
    %8 = vector.load %arg2[%c64, %c0_6] : memref<528x128xbf16, #tpu.memory_space<vmem>>, vector<32x128xbf16>
    %cst_7 = arith.constant dense<0.000000e+00> : vector<2x128xf32>
    %9 = tpu.matmul %3, %8, %cst_7 {dimension_numbers = #tpu.dot_dimension_numbers<[1], [0], [0], [1], [0, 0, 1, 1], [], []>} : vector<2x32xbf16>, vector<32x128xbf16>, vector<2x128xf32> -> vector<2x128xf32>
    %10 = arith.addf %7, %9 : vector<2x128xf32>
    %11 = vector.extract_strided_slice %5 {offsets = [0, 0], sizes = [1, 128], strides = [1, 1]} : vector<16x128xf32> to vector<1x128xf32>
    %12 = vector.broadcast %11 : vector<1x128xf32> to vector<2x128xf32>
    %13 = arith.addf %10, %12 : vector<2x128xf32>
    %14 = arith.truncf %13 : vector<2x128xf32> to vector<2x128xbf16>
    %c128 = arith.constant 128 : index
    %c0_8 = arith.constant 0 : index
    %15 = vector.load %arg2[%c128, %c0_8] : memref<528x128xbf16, #tpu.memory_space<vmem>>, vector<128x128xbf16>
    %cst_9 = arith.constant dense<0.000000e+00> : vector<2x128xf32>
    %16 = tpu.matmul %14, %15, %cst_9 {dimension_numbers = #tpu.dot_dimension_numbers<[1], [0], [0], [1], [0, 0, 1, 1], [], []>} : vector<2x128xbf16>, vector<128x128xbf16>, vector<2x128xf32> -> vector<2x128xf32>
    %17 = vector.extract_strided_slice %5 {offsets = [1, 0], sizes = [1, 128], strides = [1, 1]} : vector<16x128xf32> to vector<1x128xf32>
    %18 = vector.broadcast %17 : vector<1x128xf32> to vector<2x128xf32>
    %19 = arith.addf %16, %18 : vector<2x128xf32>
    %cst_10 = arith.constant 0.000000e+00 : f32
    %20 = vector.broadcast %cst_10 : f32 to vector<2x128xf32>
    %21 = arith.maximumf %19, %20 : vector<2x128xf32>
    %22 = arith.truncf %21 : vector<2x128xf32> to vector<2x128xbf16>
    %c256 = arith.constant 256 : index
    %c0_11 = arith.constant 0 : index
    %23 = vector.load %arg2[%c256, %c0_11] : memref<528x128xbf16, #tpu.memory_space<vmem>>, vector<128x128xbf16>
    %cst_12 = arith.constant dense<0.000000e+00> : vector<2x128xf32>
    %24 = tpu.matmul %22, %23, %cst_12 {dimension_numbers = #tpu.dot_dimension_numbers<[1], [0], [0], [1], [0, 0, 1, 1], [], []>} : vector<2x128xbf16>, vector<128x128xbf16>, vector<2x128xf32> -> vector<2x128xf32>
    %25 = vector.extract_strided_slice %5 {offsets = [2, 0], sizes = [1, 128], strides = [1, 1]} : vector<16x128xf32> to vector<1x128xf32>
    %26 = vector.broadcast %25 : vector<1x128xf32> to vector<2x128xf32>
    %27 = arith.addf %24, %26 : vector<2x128xf32>
    %cst_13 = arith.constant 0.000000e+00 : f32
    %28 = vector.broadcast %cst_13 : f32 to vector<2x128xf32>
    %29 = arith.maximumf %27, %28 : vector<2x128xf32>
    %30 = arith.truncf %29 : vector<2x128xf32> to vector<2x128xbf16>
    %c384 = arith.constant 384 : index
    %c0_14 = arith.constant 0 : index
    %31 = vector.load %arg2[%c384, %c0_14] : memref<528x128xbf16, #tpu.memory_space<vmem>>, vector<128x128xbf16>
    %cst_15 = arith.constant dense<0.000000e+00> : vector<2x128xf32>
    %32 = tpu.matmul %30, %31, %cst_15 {dimension_numbers = #tpu.dot_dimension_numbers<[1], [0], [0], [1], [0, 0, 1, 1], [], []>} : vector<2x128xbf16>, vector<128x128xbf16>, vector<2x128xf32> -> vector<2x128xf32>
    %33 = vector.extract_strided_slice %5 {offsets = [3, 0], sizes = [1, 128], strides = [1, 1]} : vector<16x128xf32> to vector<1x128xf32>
    %34 = vector.broadcast %33 : vector<1x128xf32> to vector<2x128xf32>
    %35 = arith.addf %32, %34 : vector<2x128xf32>
    %c0_16 = arith.constant 0 : index
    %c0_17 = arith.constant 0 : index
    %36 = vector.load %arg3[%c0_16, %c0_17] : memref<2x128xf32, #tpu.memory_space<vmem>>, vector<2x128xf32>
    tpu.vector_store %arg3[%c0_16, %c0_17], %35 {strides = array<i32>} : memref<2x128xf32, #tpu.memory_space<vmem>>, vector<2x128xf32>,
    return
  }
}

</mosaic_0001>

<bundles_post_ra>
// kernel: _lambda_.1
= control target key start
LH: loop header
LB: loop body
LE: loop exit
PB: predicated region body
PF: predicated region fallthrough
CT: control target
= control target key end

     0   :  { %8 = vsyncpa [#allocation3], 0  ;;  %s855_s0 = inlined_call_operand.vmem [shape: f32[2,64], index: 0, kind: input, shape index: {}]   ;;  %s856_s1 = inlined_call_operand.vmem [shape: f32[2,32], index: 1, kind: input, shape index: {}]   ;;  %s857_s2 = inlined_call_operand.hbm [shape: bf16[528,128], index: 2, kind: input, shape index: {}]   ;;  %s858_s3 = inlined_call_operand.hbm [shape: f32[2,128], index: 3, kind: output, shape index: {}]  }
   0x1   :  { %9 = vsyncpa [#allocation4], 0  ;;  %s753_s12 = smov [#allocation2]   ;;  %s705_s16 = scalar_lea.hbm %s857_s2, 4224 }
   0x2   :  { %s19_s13 = sshll.u32 %s753_s12, 4  ;;  %p706_p0 = scmp.ne.s32.totalorder %s857_s2, %s705_s16  ;;  %s20_s13 = int_to_ptr.vmem [resolvable:$true] %s19_s13 }
   0x3   :  { %p709_p1 = scmp.lt.u32.totalorder %s705_s16, %s857_s2 }
   0x5   :  { %p711_p2 = pnand %p709_p1, %p706_p0 }
   0x7   :  { %714 = shalt.err (!%p711_p2)
}
   0x8   :  { %s715_s21 = scalar_lea.vmem %s20_s13, 4224  ;;  %p720_p4 = scmp.lt.s32.totalorder %s20_s13, %s20_s13 }
   0x9   :  { %p716_p3 = scmp.ne.s32.totalorder %s20_s13, %s715_s21  ;;  %p721_p5 = scmp.lt.s32.totalorder %s715_s21, %s715_s21 }
   0xb   :  { %p722_p6 = por %p721_p5, %p720_p4 }
   0xd   :  { %p723_p7 = pnand %p722_p6, %p716_p3 }
   0xf   :  { %726 = shalt.err (!%p723_p7)
}
  0x10   :  { %s754_s22 = smov 64   ;;  %s755_s23 = smov 4  }
  0x11   :  { %25 = dma.hbm_to_vmem [thread:$0]  %s857_s2, 4224, %s20_s13, [#allocation3], %s754_s22, %s754_s22, %s755_s23  }
  0x12   :  { %749 = dma.done.wait [#allocation3], 4224  }
  0x13   :  { %750 = vsyncadd [#allocation3], 4294963072  ;;  %v756_v0 = vmov 0.0   ;;  %vm757_vm0 = vmmov 0   ;;  %v675_v1 = vld [vmem:[#allocation2 + $0x20] sm:$0xff]   ;;  %v676_v2 = vld [vmem:[#allocation2 + $0x28] sm:$0xff]   ;;  %v172_v29 = vlaneseq }
  0x14   :  { %589 = vmatprep.subr.bf16.mxu1 %v756_v0  ;;  %593 = vmatprep.mubr.msk.bf16.mxu1 %vm757_vm0, %v756_v0  ;;  %v32_v3 = vld [vmem:[%s856_s1] sm:$0x3]  ;;  %vm60_vm1 = vcmask 261120   ;;  %v678_v7 = vld [vmem:[#allocation2 + $0x8] sm:$0xff]   ;;  %v679_v9 = vld [vmem:[#allocation2 + $0x10] sm:$0xff]   ;;  %vm128_vm2 = vcmask 523264  }
  0x15   :  { %609 = vmatprep.subr.bf16.mxu0 %v756_v0  ;;  %625 = vmatprep.mubr.msk.bf16.mxu0 %vm757_vm0, %v756_v0  ;;  %v33_v4 = vpack.c.bf16 %v32_v3, %v32_v3  ;;  %v677_v5 = vld [vmem:[#allocation2] sm:$0xff]   ;;  %v682_v8 = vld [vmem:[#allocation2 + $0x48] sm:$0xff]   ;;  %v680_v10 = vld [vmem:[#allocation2 + $0x18] sm:$0xff]   ;;  %v827_v30 = vshrl.u32 %v172_v29, 7 }
  0x16   :  { %590 = vmatpush3.bf16.msra.mxu1 %v675_v1  ;;  %v681_v6 = vld [vmem:[#allocation2 + $0x40] sm:$0xff]   ;;  %v683_v13 = vld [vmem:[#allocation2 + $0x50] sm:$0xff]   ;;  %v684_v14 = vld [vmem:[#allocation2 + $0x58] sm:$0xff]  }
  0x17   :  { %591 = vmatprep.subr.bf16.mxu1 %v756_v0  ;;  %610 = vmatpush3.bf16.msra.mxu0 %v681_v6  ;;  %v30_v11 = vld [vmem:[%s855_s0] sm:$0x3]  ;;  %v686_v16 = vld [vmem:[#allocation2 + $0x68] sm:$0xff]   ;;  %v687_v17 = vld [vmem:[#allocation2 + $0x70] sm:$0xff]   ;;  %v174_v33 = vsub.s32 0, %v827_v30  ;;  %v196_v50 = vsub.s32 1, %v827_v30 }
  0x18   :  { %611 = vmatprep.subr.bf16.mxu0 %v756_v0  ;;  %v31_v12 = vpack.c.bf16 %v30_v11, %v30_v11  ;;  %v685_v15 = vld [vmem:[#allocation2 + $0x60] sm:$0xff]   ;;  %v688_v18 = vld [vmem:[#allocation2 + $0x78] sm:$0xff]   ;;  %v690_v20 = vld [vmem:[#allocation2 + $0x88] sm:$0xff]   ;;  %v306_v61 = vsub.s32 2, %v827_v30  ;;  %s758_s0 = smov [#allocation5]  }
  0x19   :  { %v689_v19 = vld [vmem:[#allocation2 + $0x80] sm:$0xff]   ;;  %v691_v21 = vld [vmem:[#allocation2 + $0x90] sm:$0xff]   ;;  %v692_v22 = vld [vmem:[#allocation2 + $0x98] sm:$0xff]   ;;  %s513_s28 = sshll.u32 %s758_s0, 4  ;;  %s514_s28 = int_to_ptr.vmem [resolvable:$true] %s513_s28 }
  0x1a   :  { %592 = vmatpush3.bf16.msra.mxu1 %v676_v2  ;;  %v693_v23 = vld [vmem:[#allocation2 + $0xa0] sm:$0xff]   ;;  %v694_v24 = vld [vmem:[#allocation2 + $0xa8] sm:$0xff]   ;;  %v695_v42 = vld [vmem:[#allocation2 + $0xb0] sm:$0xff]   ;;  %s727_s29 = scalar_lea.vmem %s514_s28, 32  ;;  %p732_p9 = scmp.lt.s32.totalorder %s514_s28, %s514_s28 }
  0x1b   :  { %597 = vmatprep.subr.bf16.mxu1 %v756_v0  ;;  %612 = vmatpush3.bf16.msra.mxu0 %v682_v8  ;;  %v34_v31 = vld [vmem:[#allocation2 + $0x100] sm:$0xf]  ;;  %v696_v43 = vld [vmem:[#allocation2 + $0xb8] sm:$0xff]   ;;  %v698_v45 = vld [vmem:[#allocation2 + $0xc8] sm:$0xff]   ;;  %p728_p8 = scmp.ne.s32.totalorder %s514_s28, %s727_s29  ;;  %p733_p10 = scmp.lt.s32.totalorder %s727_s29, %s727_s29 }
  0x1c   :  { %613 = vmatprep.subr.bf16.mxu0 %v756_v0  ;;  %v35_v32 = vunpack.c.l.bf16 %v34_v31  ;;  %v697_v44 = vld [vmem:[#allocation2 + $0xc0] sm:$0xff]   ;;  %v699_v46 = vld [vmem:[#allocation2 + $0xd0] sm:$0xff]   ;;  %v700_v47 = vld [vmem:[#allocation2 + $0xd8] sm:$0xff]  }
  0x1d   :  { %594 = vmatmul.mubr.msk.bf16.vlgmr.msra.gmra.mrb[0].mxu1 %vm60_vm1, %v33_v4  ;;  %v701_v48 = vld [vmem:[#allocation2 + $0xe0] sm:$0xff]   ;;  %v702_v49 = vld [vmem:[#allocation2 + $0xe8] sm:$0xff]   ;;  %v703_v59 = vld [vmem:[#allocation2 + $0xf0] sm:$0xff]   ;;  %p734_p11 = por %p733_p10, %p732_p9 }
  0x1e   :  { %598 = vmatpush3.bf16.msra.mxu1 %v677_v5  ;;  %605 = vmatprep.mubr.msk.bf16.mxu1 %vm757_vm0, %v756_v0  ;;  %v175_v34 = vrot.slane %v35_v32, %v174_v33  ;;  %v197_v51 = vrot.slane %v35_v32, %v196_v50  ;;  %v704_v60 = vld [vmem:[#allocation2 + $0xf8] sm:$0xff]   ;;  %v307_v62 = vrot.slane %v35_v32, %v306_v61 }
  0x1f   :  { %599 = vmatprep.subr.bf16.mxu1 %v756_v0  ;;  %614 = vmatpush3.bf16.msra.mxu0 %v683_v13  ;;  %p735_p12 = pnand %p734_p11, %p728_p8 }
  0x20   :  { %615 = vmatprep.subr.bf16.mxu0 %v756_v0 }
  0x22   :  { %600 = vmatpush3.bf16.msra.mxu1 %v678_v7  ;;  %v416_v7 = vsub.s32 3, %v827_v30 }
  0x23   :  { %601 = vmatprep.subr.bf16.mxu1 %v756_v0  ;;  %616 = vmatpush3.bf16.msra.mxu0 %v684_v14 }
  0x24   :  { %617 = vmatprep.subr.bf16.mxu0 %v756_v0  ;;  %v417_v8 = vrot.slane %v35_v32, %v416_v7 }
  0x26   :  { %602 = vmatpush3.bf16.msra.mxu1 %v679_v9 }
  0x27   :  { %603 = vmatprep.subr.bf16.mxu1 %v756_v0  ;;  %618 = vmatpush3.bf16.msra.mxu0 %v685_v15 }
  0x28   :  { %619 = vmatprep.subr.bf16.mxu0 %v756_v0 }
  0x2a   :  { %604 = vmatpush3.bf16.msra.mxu1 %v680_v10 }
  0x2b   :  { %629 = vmatprep.subr.bf16.mxu1 %v756_v0  ;;  %620 = vmatpush3.bf16.msra.mxu0 %v686_v16 }
  0x2c   :  { %621 = vmatprep.subr.bf16.mxu0 %v756_v0 }
  0x2d   :  { %606 = vmatmul.mubr.msk.bf16.vlgmr.msra.gmra.mrb[4].mxu1 %vm128_vm2, %v31_v12 }
  0x2e   :  { %645 = vmatprep.mubr.msk.bf16.mxu1 %vm757_vm0, %v756_v0  ;;  %630 = vmatpush3.bf16.msra.mxu1 %v689_v19 }
  0x2f   :  { %622 = vmatpush3.bf16.msra.mxu0 %v687_v17  ;;  %631 = vmatprep.subr.bf16.mxu1 %v756_v0 }
  0x30   :  { %623 = vmatprep.subr.bf16.mxu0 %v756_v0 }
  0x32   :  { %632 = vmatpush3.bf16.msra.mxu1 %v690_v20 }
  0x33   :  { %624 = vmatpush3.bf16.msra.mxu0 %v688_v18  ;;  %633 = vmatprep.subr.bf16.mxu1 %v756_v0 }
  0x34   :  { %649 = vmatprep.subr.bf16.mxu0 %v756_v0 }
  0x36   :  { %634 = vmatpush3.bf16.msra.mxu1 %v691_v21 }
  0x37   :  { %635 = vmatprep.subr.bf16.mxu1 %v756_v0 }
  0x3a   :  { %636 = vmatpush3.bf16.msra.mxu1 %v692_v22 }
  0x3b   :  { %637 = vmatprep.subr.bf16.mxu1 %v756_v0 }
  0x3e   :  { %638 = vmatpush3.bf16.msra.mxu1 %v693_v23 }
  0x3f   :  { %639 = vmatprep.subr.bf16.mxu1 %v756_v0 }
  0x42   :  { %640 = vmatpush3.bf16.msra.mxu1 %v694_v24 }
  0x43   :  { %641 = vmatprep.subr.bf16.mxu1 %v756_v0 }
  0x46   :  { %642 = vmatpush3.bf16.msra.mxu1 %v695_v42 }
  0x47   :  { %643 = vmatprep.subr.bf16.mxu1 %v756_v0 }
  0x4a   :  { %644 = vmatpush3.bf16.msra.mxu1 %v696_v43 }
  0xf0   :  { %v98_v25 = vpop.f32.mrb[0].mxu1 }
  0xf1   :  { %v595_v26 = vpop.f32.mrb[1].mxu1 }
  0xf2   :  { %v101_v27 = vpop.f32.mrb[2].mxu1 }
  0xf3   :  { %v596_v28 = vpop.f32.mrb[3].mxu1 }
 0x100   :  { %v166_v35 = vpop.f32.mrb[4].mxu1 }
 0x101   :  { %v167_v36 = vadd.f32 %v166_v35, %v98_v25  ;;  %v607_v37 = vpop.f32.mrb[5].mxu1 }
 0x102   :  { %v169_v38 = vpop.f32.mrb[6].mxu1 }
 0x103   :  { %v176_v39 = vadd.f32 %v175_v34, %v167_v36  ;;  %v608_v40 = vpop.f32.mrb[7].mxu1 }
 0x105   :  { %v177_v41 = vpack.c.bf16 %v176_v39, %v176_v39 }
 0x107   :  { %626 = vmatmul.mubr.bf16.vlgmr.msra.gmra.mrb[0].mxu0 %v177_v41 }
 0x108   :  { %665 = vmatprep.mubr.msk.bf16.mxu0 %vm757_vm0, %v756_v0  ;;  %650 = vmatpush3.bf16.msra.mxu0 %v697_v44 }
 0x109   :  { %651 = vmatprep.subr.bf16.mxu0 %v756_v0 }
 0x10c   :  { %652 = vmatpush3.bf16.msra.mxu0 %v698_v45 }
 0x10d   :  { %653 = vmatprep.subr.bf16.mxu0 %v756_v0 }
 0x110   :  { %654 = vmatpush3.bf16.msra.mxu0 %v699_v46 }
 0x111   :  { %655 = vmatprep.subr.bf16.mxu0 %v756_v0 }
 0x114   :  { %656 = vmatpush3.bf16.msra.mxu0 %v700_v47 }
 0x115   :  { %657 = vmatprep.subr.bf16.mxu0 %v756_v0 }
 0x118   :  { %658 = vmatpush3.bf16.msra.mxu0 %v701_v48 }
 0x119   :  { %659 = vmatprep.subr.bf16.mxu0 %v756_v0 }
 0x11c   :  { %660 = vmatpush3.bf16.msra.mxu0 %v702_v49 }
 0x11d   :  { %661 = vmatprep.subr.bf16.mxu0 %v756_v0 }
 0x120   :  { %662 = vmatpush3.bf16.msra.mxu0 %v703_v59 }
 0x121   :  { %663 = vmatprep.subr.bf16.mxu0 %v756_v0 }
 0x124   :  { %664 = vmatpush3.bf16.msra.mxu0 %v704_v60 }
 0x1da   :  { %v280_v52 = vpop.f32.mrb[0].mxu0 }
 0x1db   :  { %v281_v53 = vadd.f32 %v280_v52, %v197_v51  ;;  %v627_v54 = vpop.f32.mrb[1].mxu0 }
 0x1dc   :  { %v283_v55 = vpop.f32.mrb[2].mxu0 }
 0x1dd   :  { %v286_v56 = vmax.f32 %v281_v53, 0.0  ;;  %v628_v57 = vpop.f32.mrb[3].mxu0 }
 0x1df   :  { %v287_v58 = vpack.c.bf16 %v286_v56, %v286_v56 }
 0x1e1   :  { %646 = vmatmul.mubr.bf16.vlgmr.msra.gmra.mrb[8].mxu1 %v287_v58 }
 0x2b4   :  { %v390_v63 = vpop.f32.mrb[8].mxu1 }
 0x2b5   :  { %v391_v1 = vadd.f32 %v390_v63, %v307_v62  ;;  %v647_v2 = vpop.f32.mrb[9].mxu1 }
 0x2b6   :  { %v393_v3 = vpop.f32.mrb[10].mxu1 }
 0x2b7   :  { %v396_v4 = vmax.f32 %v391_v1, 0.0  ;;  %v648_v5 = vpop.f32.mrb[11].mxu1 }
 0x2b9   :  { %v397_v6 = vpack.c.bf16 %v396_v4, %v396_v4 }
 0x2bb   :  { %666 = vmatmul.mubr.bf16.vlgmr.msra.gmra.mrb[4].mxu0 %v397_v6 }
 0x38e   :  { %v500_v9 = vpop.f32.mrb[4].mxu0 }
 0x38f   :  { %v501_v0 = vadd.f32 %v500_v9, %v417_v8  ;;  %v667_v10 = vpop.f32.mrb[5].mxu0 }
 0x390   :  { %v503_v11 = vpop.f32.mrb[6].mxu0 }
 0x391   :  { %506 = vst [vmem:[#allocation5] sm:$0x3] %v501_v0  ;;  %v668_v12 = vpop.f32.mrb[7].mxu0 }
 0x392   :  { %738 = shalt.err (!%p735_p12)
}
 0x393   :  { %s739_s5 = scalar_lea.hbm %s858_s3, 32 }
 0x394   :  { %p740_p13 = scmp.ne.s32.totalorder %s858_s3, %s739_s5  ;;  %p743_p0 = scmp.lt.u32.totalorder %s739_s5, %s858_s3 }
 0x396   :  { %p745_p1 = pnand %p743_p0, %p740_p13 }
 0x398   :  { %748 = shalt.err (!%p745_p1)
}
 0x399   :  { %516 = dma.vmem_to_hbm [thread:$0]  %s514_s28, 32, %s858_s3, [#allocation4]  }
 0x39a   :  { %751 = dma.done.wait [#allocation4], 32  }
 0x39b   :  { %752 = vsyncadd [#allocation4], 4294967264 }
 0x39c   :  { %520 = vsyncpa [#allocation3], 1 }
 0x39d   :  { %521 = vsyncpa [#allocation4], 1 }

</bundles_post_ra>
